<compile_context>
chip_gen: v7x
topology: tpu7x:2x2x1
jax: 0.10.0
libtpu: 0.0.40
codegen_flags: <defaults>
</compile_context>

<pallas_src>
import functools

import jax
import jax.numpy as jnp
from jax.experimental import pallas as pl
from jax.experimental.pallas import tpu as pltpu

_LANE = 128
_SUBLANE = 8


def _round_up(x, m):
    return ((x + m - 1) // m) * m


def _vmem_budget_and_batch_tile():
    """Generation-dependent VMEM budget (bytes) and max batch tile."""
    cap = None
    try:
        cap = int(pltpu.get_tpu_info().vmem_capacity_bytes)
    except Exception:
        cap = None
    if cap is None:
        try:
            kind = jax.devices()[0].device_kind.lower()
            cap = (64 << 20) if "7" in kind else (128 << 20)
        except Exception:
            cap = 64 << 20  # conservative: v7x per-TC VMEM
    budget = min((3 * cap) // 4, 96 << 20)  # ~48 MiB on v7x, ~96 MiB on v5e/v6e
    max_tb = 512 if cap >= (100 << 20) else 256
    return budget, max_tb


def _pick_vocab_tile(v_pad, e, h, c_pad, tb, vmem_budget):
    """Largest lane-multiple vocab tile whose working set fits the budget."""
    resident = (2 * e * h              # w1 (bf16, single-buffered)
                + 4 * h                # b1 (f32)
                + 4 * h * c_pad        # w2 (f32)
                + 4 * c_pad            # b2 (f32)
                + 4 * tb * e           # pooled accumulator scratch (f32)
                + 2 * 4 * tb * c_pad)  # out block (f32, double-buffered)
    avail = vmem_budget - resident - (4 << 20)  # compiler/internal headroom
    per_col = 2 * 2 * (tb + e)  # counts col + table row, bf16, double-buffered
    tv = max(_LANE, (max(avail, 0) // per_col) // _LANE * _LANE)
    return int(min(tv, v_pad))


def mlp_kernel(counts_ref, table_ref, w1_ref, b1_ref, w2_ref, b2_ref, out_ref,
               pooled_ref, *, num_class, inv_seq_len):
    # counts_ref : (TB, TV) bf16  -- integer token counts for this vocab tile
    # table_ref  : (TV, E)  bf16  -- embedding rows for this vocab tile
    # w1_ref     : (E, H)   bf16;  b1_ref: (1, H) f32
    # w2_ref     : (H, Cp)  f32;   b2_ref: (1, Cp) f32 (class-padded)
    # out_ref    : (TB, Cp) f32;   pooled_ref: (TB, E) f32 scratch accumulator
    kv = pl.program_id(1)

    @pl.when(kv == 0)
    def _():
        pooled_ref[...] = jnp.zeros_like(pooled_ref)

    # Fused gather + sum-pool: bf16 MXU matmul, f32 accumulation.
    pooled_ref[...] += jnp.dot(counts_ref[...], table_ref[...],
                               preferred_element_type=jnp.float32)

    @pl.when(kv == pl.num_programs(1) - 1)
    def _():
        # mean over sequence applied in-kernel (counts stay exact integers).
        pooled = (pooled_ref[...] * jnp.float32(inv_seq_len)).astype(jnp.bfloat16)

        h = jnp.dot(pooled, w1_ref[...],
                    preferred_element_type=jnp.float32) + b1_ref[...]
        h = jnp.maximum(h, 0.0)                                   # F.relu

        # Tiny final layer kept f32 for accuracy (negligible cost).
        logits = jnp.dot(h, w2_ref[...],
                         preferred_element_type=jnp.float32) + b2_ref[...]

        # Mask padded class lanes before the log_softmax max/sum so the store
        # stays a full-width (lane-dense) vst.
        lane = jax.lax.broadcasted_iota(jnp.int32, logits.shape, 1)
        logits = jnp.where(lane < num_class, logits, jnp.float32(-1e30))

        m = jnp.max(logits, axis=1, keepdims=True)
        shifted = logits - m
        lse = jnp.log(jnp.sum(jnp.exp(shifted), axis=1, keepdims=True))
        out_ref[...] = shifted - lse                              # log-probs


def mlp_forward(inputs, offsets, embedding_table, w1, b1, w2, b2):
    # `offsets` accepted for signature parity with the PyTorch module; unused
    # there as well.
    del offsets
    B, S = inputs.shape
    V, E = embedding_table.shape
    H = w1.shape[1]
    C = w2.shape[1]

    vmem_budget, max_tb = _vmem_budget_and_batch_tile()

    C_pad = _round_up(C, _LANE)                # lane-dense output store
    TB = min(max_tb, _round_up(B, _SUBLANE))   # never pad small batches up
    B_pad = _round_up(B, TB)

    V_pad = _round_up(V, _LANE)
    TV = _pick_vocab_tile(V_pad, E, H, C_pad, TB, vmem_budget)
    if TV < V_pad:
        V_pad = _round_up(V_pad, TV)
    n_vocab_tiles = V_pad // TV

    # Fused gather + mean-pool as a matmul operand: counts[b, v] = number of
    # occurrences of token v in row b, built by scatter-add (no [B,S,V]
    # intermediate).  Integer counts are exact in bf16; 1/S applied in-kernel.
    row_idx = jnp.arange(B, dtype=jnp.int32)[:, None]
    counts = jnp.zeros((B, V_pad), jnp.float32).at[row_idx, inputs].add(1.0)
    counts = jnp.pad(counts.astype(jnp.bfloat16), ((0, B_pad - B), (0, 0)))

    table_pad = jnp.pad(embedding_table,
                        ((0, V_pad - V), (0, 0))).astype(jnp.bfloat16)
    w1_bf = w1.astype(jnp.bfloat16)
    b1_2d = b1.reshape(1, H).astype(jnp.float32)
    w2_pad = jnp.pad(w2, ((0, 0), (0, C_pad - C))).astype(jnp.float32)
    b2_pad = jnp.pad(b2.reshape(1, C),
                     ((0, 0), (0, C_pad - C))).astype(jnp.float32)

    grid = (B_pad // TB, n_vocab_tiles)
    bytes_accessed = (2 * (counts.size + table_pad.size + w1_bf.size)
                      + 4 * (b1_2d.size + w2_pad.size + b2_pad.size
                             + B_pad * C_pad))
    cost = pl.CostEstimate(
        flops=2 * B_pad * (V_pad * E + E * H + H * C_pad),
        transcendentals=2 * B_pad * C_pad,
        bytes_accessed=bytes_accessed,
    )

    kernel = functools.partial(mlp_kernel, num_class=C, inv_seq_len=1.0 / S)

    def build_and_run(single_buffer_residents):
        resident_kw = (dict(pipeline_mode=pl.Buffered(1))
                       if single_buffer_residents else {})
        table_kw = resident_kw if n_vocab_tiles == 1 else {}
        in_specs = [
            pl.BlockSpec((TB, TV), lambda i, k: (i, k)),              # counts (streamed)
            pl.BlockSpec((TV, E), lambda i, k: (k, 0), **table_kw),   # embedding table
            pl.BlockSpec((E, H), lambda i, k: (0, 0), **resident_kw),     # w1
            pl.BlockSpec((1, H), lambda i, k: (0, 0), **resident_kw),     # b1
            pl.BlockSpec((H, C_pad), lambda i, k: (0, 0), **resident_kw),  # w2
            pl.BlockSpec((1, C_pad), lambda i, k: (0, 0), **resident_kw),  # b2
        ]
        return pl.pallas_call(
            kernel,
            out_shape=jax.ShapeDtypeStruct((B_pad, C_pad), jnp.float32),
            grid_spec=pltpu.PrefetchScalarGridSpec(
                num_scalar_prefetch=0,
                grid=grid,
                in_specs=in_specs,
                out_specs=pl.BlockSpec((TB, C_pad), lambda i, k: (i, 0)),
                scratch_shapes=[pltpu.VMEM((TB, E), jnp.float32)],
            ),
            compiler_params=pltpu.CompilerParams(
                dimension_semantics=("parallel", "arbitrary"),
                vmem_limit_bytes=vmem_budget,
            ),
            cost_estimate=cost,
        )(counts, table_pad, w1_bf, b1_2d, w2_pad, b2_pad)

    try:
        out = build_and_run(True)
    except Exception:
        # Fallback for JAX versions without BlockSpec(pipeline_mode=...):
        # default double-buffering (slightly more VMEM, same results).
        out = build_and_run(False)

    return out[:B, :C]


if __name__ == "__main__":
    # Module hyper-params (shapes from MLP.__init__), small demo sizes.
    vocab_size = 100
    embedding_dim = 128
    hidden_dim = 256
    num_class = 2
    batch = 8
    seq = 8

    key = jax.random.PRNGKey(0)
    k_emb, k_w1, k_b1, k_w2, k_b2, k_in = jax.random.split(key, 6)

    embedding_table = jax.random.normal(
        k_emb, (vocab_size, embedding_dim), dtype=jnp.float32) * 0.1
    # Linear weights stored as [in, out] (transpose of PyTorch's [out, in]).
    w1 = jax.random.normal(k_w1, (embedding_dim, hidden_dim),
                           dtype=jnp.float32) * 0.05
    b1 = jax.random.normal(k_b1, (hidden_dim,), dtype=jnp.float32) * 0.05
    w2 = jax.random.normal(k_w2, (hidden_dim, num_class),
                           dtype=jnp.float32) * 0.05
    b2 = jax.random.normal(k_b2, (num_class,), dtype=jnp.float32) * 0.05

    inputs = jax.random.randint(k_in, (batch, seq), 0, vocab_size,
                                dtype=jnp.int32)
    offsets = jnp.arange(batch, dtype=jnp.int32) * seq

    log_probs = mlp_forward(inputs, offsets, embedding_table, w1, b1, w2, b2)
    log_probs = jax.block_until_ready(log_probs)

    # Pure-JAX f32 reference (mirrors the PyTorch forward).  The kernel uses
    # bf16 operands (f32 accumulation) for the two large matmuls, so the
    # tolerance is loosened accordingly.
    emb = embedding_table[inputs].mean(axis=1)
    h = jnp.maximum(emb @ w1 + b1, 0.0)
    logits = h @ w2 + b2
    ref = jax.nn.log_softmax(logits, axis=1)

    assert log_probs.shape == (batch, num_class)
    max_err = float(jnp.max(jnp.abs(log_probs - ref)))
    assert max_err < 2e-2, max_err

    print("KERNEL_OK")
</pallas_src>

<mosaic_0001>
module attributes {stable_mosaic.version = 11 : i64} {
  func.func @mlp_kernel(%arg0: i32, %arg1: i32, %arg2: memref<8x128xbf16, #tpu.memory_space<vmem>>, %arg3: memref<128x128xbf16, #tpu.memory_space<vmem>>, %arg4: memref<128x256xbf16, #tpu.memory_space<vmem>>, %arg5: memref<1x256xf32, #tpu.memory_space<vmem>>, %arg6: memref<256x128xf32, #tpu.memory_space<vmem>>, %arg7: memref<1x128xf32, #tpu.memory_space<vmem>>, %arg8: memref<8x128xf32, #tpu.memory_space<vmem>>, %arg9: memref<8x128xf32, #tpu.memory_space<vmem>>) attributes {dimension_semantics = [#tpu.dimension_semantics<parallel>, #tpu.dimension_semantics<arbitrary>], iteration_bounds = array<i64: 1, 1>, scalar_prefetch = 0 : i64, scratch_operands = 1 : i64, tpu.core_type = #tpu.core_type<tc>, window_params = [{transform_indices = @transform_0, window_bounds = array<i64: 8, 128>}, {pipeline_mode = #tpu.pipeline_mode<synchronous>, transform_indices = @transform_1, window_bounds = array<i64: 128, 128>}, {pipeline_mode = #tpu.pipeline_mode<synchronous>, transform_indices = @transform_2, window_bounds = array<i64: 128, 256>}, {pipeline_mode = #tpu.pipeline_mode<synchronous>, transform_indices = @transform_3, window_bounds = array<i64: 1, 256>}, {pipeline_mode = #tpu.pipeline_mode<synchronous>, transform_indices = @transform_4, window_bounds = array<i64: 256, 128>}, {pipeline_mode = #tpu.pipeline_mode<synchronous>, transform_indices = @transform_5, window_bounds = array<i64: 1, 128>}, {transform_indices = @transform_6, window_bounds = array<i64: 8, 128>}]} {
    %c0_i32 = arith.constant 0 : i32
    %0 = arith.cmpi eq, %arg1, %c0_i32 : i32
    %1 = arith.extui %0 : i1 to i32
    %c0_i32_0 = arith.constant 0 : i32
    %2 = arith.cmpi ne, %1, %c0_i32_0 : i32
    scf.if %2 {
      %cst_10 = arith.constant 0.000000e+00 : f32
      %12 = vector.broadcast %cst_10 : f32 to vector<8x128xf32>
      %c0_11 = arith.constant 0 : index
      %c0_12 = arith.constant 0 : index
      %13 = vector.load %arg9[%c0_11, %c0_12] : memref<8x128xf32, #tpu.memory_space<vmem>>, vector<8x128xf32>
      tpu.vector_store %arg9[%c0_11, %c0_12], %12 {strides = array<i32>} : memref<8x128xf32, #tpu.memory_space<vmem>>, vector<8x128xf32>,
    } else {
    }
    %c0 = arith.constant 0 : index
    %c0_1 = arith.constant 0 : index
    %3 = vector.load %arg9[%c0, %c0_1] : memref<8x128xf32, #tpu.memory_space<vmem>>, vector<8x128xf32>
    %c0_2 = arith.constant 0 : index
    %c0_3 = arith.constant 0 : index
    %4 = vector.load %arg2[%c0_2, %c0_3] : memref<8x128xbf16, #tpu.memory_space<vmem>>, vector<8x128xbf16>
    %c0_4 = arith.constant 0 : index
    %c0_5 = arith.constant 0 : index
    %5 = vector.load %arg3[%c0_4, %c0_5] : memref<128x128xbf16, #tpu.memory_space<vmem>>, vector<128x128xbf16>
    %cst = arith.constant dense<0.000000e+00> : vector<8x128xf32>
    %6 = tpu.matmul %4, %5, %cst {dimension_numbers = #tpu.dot_dimension_numbers<[1], [0], [0], [1], [0, 0, 1, 1], [], []>} : vector<8x128xbf16>, vector<128x128xbf16>, vector<8x128xf32> -> vector<8x128xf32>
    %7 = arith.addf %3, %6 : vector<8x128xf32>
    %c0_6 = arith.constant 0 : index
    %c0_7 = arith.constant 0 : index
    %8 = vector.load %arg9[%c0_6, %c0_7] : memref<8x128xf32, #tpu.memory_space<vmem>>, vector<8x128xf32>
    tpu.vector_store %arg9[%c0_6, %c0_7], %7 {strides = array<i32>} : memref<8x128xf32, #tpu.memory_space<vmem>>, vector<8x128xf32>,
    %c0_i32_8 = arith.constant 0 : i32
    %9 = arith.cmpi eq, %arg1, %c0_i32_8 : i32
    %10 = arith.extui %9 : i1 to i32
    %c0_i32_9 = arith.constant 0 : i32
    %11 = arith.cmpi ne, %10, %c0_i32_9 : i32
    scf.if %11 {
      %c0_10 = arith.constant 0 : index
      %c0_11 = arith.constant 0 : index
      %12 = vector.load %arg9[%c0_10, %c0_11] : memref<8x128xf32, #tpu.memory_space<vmem>>, vector<8x128xf32>
      %cst_12 = arith.constant 1.250000e-01 : f32
      %13 = vector.broadcast %cst_12 : f32 to vector<8x128xf32>
      %14 = arith.mulf %12, %13 : vector<8x128xf32>
      %15 = arith.truncf %14 : vector<8x128xf32> to vector<8x128xbf16>
      %c0_13 = arith.constant 0 : index
      %c0_14 = arith.constant 0 : index
      %16 = vector.load %arg4[%c0_13, %c0_14] : memref<128x256xbf16, #tpu.memory_space<vmem>>, vector<128x256xbf16>
      %cst_15 = arith.constant dense<0.000000e+00> : vector<8x256xf32>
      %17 = tpu.matmul %15, %16, %cst_15 {dimension_numbers = #tpu.dot_dimension_numbers<[1], [0], [0], [1], [0, 0, 1, 1], [], []>} : vector<8x128xbf16>, vector<128x256xbf16>, vector<8x256xf32> -> vector<8x256xf32>
      %c0_16 = arith.constant 0 : index
      %c0_17 = arith.constant 0 : index
      %18 = vector.load %arg5[%c0_16, %c0_17] : memref<1x256xf32, #tpu.memory_space<vmem>>, vector<1x256xf32>
      %19 = vector.broadcast %18 : vector<1x256xf32> to vector<8x256xf32>
      %20 = arith.addf %17, %19 : vector<8x256xf32>
      %cst_18 = arith.constant 0.000000e+00 : f32
      %21 = vector.broadcast %cst_18 : f32 to vector<8x256xf32>
      %22 = arith.maximumf %20, %21 : vector<8x256xf32>
      %c0_19 = arith.constant 0 : index
      %c0_20 = arith.constant 0 : index
      %23 = vector.load %arg6[%c0_19, %c0_20] : memref<256x128xf32, #tpu.memory_space<vmem>>, vector<256x128xf32>
      %cst_21 = arith.constant dense<0.000000e+00> : vector<8x128xf32>
      %24 = tpu.matmul %22, %23, %cst_21 {dimension_numbers = #tpu.dot_dimension_numbers<[1], [0], [0], [1], [0, 0, 1, 1], [], []>} : vector<8x256xf32>, vector<256x128xf32>, vector<8x128xf32> -> vector<8x128xf32>
      %c0_22 = arith.constant 0 : index
      %c0_23 = arith.constant 0 : index
      %25 = vector.load %arg7[%c0_22, %c0_23] : memref<1x128xf32, #tpu.memory_space<vmem>>, vector<1x128xf32>
      %26 = vector.broadcast %25 : vector<1x128xf32> to vector<8x128xf32>
      %27 = arith.addf %24, %26 : vector<8x128xf32>
      %28 = tpu.iota {dimensions = array<i32: 1>} : vector<8x128xi32>
      %c2_i32 = arith.constant 2 : i32
      %29 = vector.broadcast %c2_i32 : i32 to vector<8x128xi32>
      %30 = arith.cmpi slt, %28, %29 : vector<8x128xi32>
      %cst_24 = arith.constant -1.000000e+30 : f32
      %31 = vector.broadcast %cst_24 : f32 to vector<8x128xf32>
      %32 = arith.select %30, %27, %31 : vector<8x128xi1>, vector<8x128xf32>
      %cst_25 = arith.constant dense<0xFF800000> : vector<8xf32>
      %33 = vector.multi_reduction <maximumf>, %32, %cst_25 [1] : vector<8x128xf32> to vector<8xf32>
      %34 = vector.shape_cast %33 : vector<8xf32> to vector<8x1xf32>
      %35 = vector.broadcast %34 : vector<8x1xf32> to vector<8x128xf32>
      %36 = arith.subf %32, %35 : vector<8x128xf32>
      %37 = math.exp %36 : vector<8x128xf32>
      %cst_26 = arith.constant dense<0.000000e+00> : vector<8xf32>
      %38 = vector.multi_reduction <add>, %37, %cst_26 [1] : vector<8x128xf32> to vector<8xf32>
      %39 = vector.shape_cast %38 : vector<8xf32> to vector<8x1xf32>
      %40 = math.log %39 : vector<8x1xf32>
      %41 = vector.broadcast %40 : vector<8x1xf32> to vector<8x128xf32>
      %42 = arith.subf %36, %41 : vector<8x128xf32>
      %c0_27 = arith.constant 0 : index
      %c0_28 = arith.constant 0 : index
      %43 = vector.load %arg8[%c0_27, %c0_28] : memref<8x128xf32, #tpu.memory_space<vmem>>, vector<8x128xf32>
      tpu.vector_store %arg8[%c0_27, %c0_28], %42 {strides = array<i32>} : memref<8x128xf32, #tpu.memory_space<vmem>>, vector<8x128xf32>,
    } else {
    }
    return
  }
  func.func @transform_0(%arg0: i32, %arg1: i32) -> (i32, i32) {
    %c0_i32 = arith.constant 0 : i32
    return %arg0, %arg1 : i32, i32
  }
  func.func @transform_1(%arg0: i32, %arg1: i32) -> (i32, i32) {
    %c0_i32 = arith.constant 0 : i32
    %c0_i32_0 = arith.constant 0 : i32
    return %arg1, %c0_i32 : i32, i32
  }
  func.func @transform_2(%arg0: i32, %arg1: i32) -> (i32, i32) {
    %c0_i32 = arith.constant 0 : i32
    %c0_i32_0 = arith.constant 0 : i32
    %c0_i32_1 = arith.constant 0 : i32
    return %c0_i32, %c0_i32_0 : i32, i32
  }
  func.func @transform_3(%arg0: i32, %arg1: i32) -> (i32, i32) {
    %c0_i32 = arith.constant 0 : i32
    %c0_i32_0 = arith.constant 0 : i32
    %c0_i32_1 = arith.constant 0 : i32
    return %c0_i32, %c0_i32_0 : i32, i32
  }
  func.func @transform_4(%arg0: i32, %arg1: i32) -> (i32, i32) {
    %c0_i32 = arith.constant 0 : i32
    %c0_i32_0 = arith.constant 0 : i32
    %c0_i32_1 = arith.constant 0 : i32
    return %c0_i32, %c0_i32_0 : i32, i32
  }
  func.func @transform_5(%arg0: i32, %arg1: i32) -> (i32, i32) {
    %c0_i32 = arith.constant 0 : i32
    %c0_i32_0 = arith.constant 0 : i32
    %c0_i32_1 = arith.constant 0 : i32
    return %c0_i32, %c0_i32_0 : i32, i32
  }
  func.func @transform_6(%arg0: i32, %arg1: i32) -> (i32, i32) {
    %c0_i32 = arith.constant 0 : i32
    %c0_i32_0 = arith.constant 0 : i32
    return %arg0, %c0_i32 : i32, i32
  }
}

module attributes {stable_mosaic.version = 11 : i64} {
  func.func @mlp_kernel(%arg0: i32, %arg1: i32, %arg2: memref<8x128xbf16, #tpu.memory_space<vmem>>, %arg3: memref<128x128xbf16, #tpu.memory_space<vmem>>, %arg4: memref<128x256xbf16, #tpu.memory_space<vmem>>, %arg5: memref<1x256xf32, #tpu.memory_space<vmem>>, %arg6: memref<256x128xf32, #tpu.memory_space<vmem>>, %arg7: memref<1x128xf32, #tpu.memory_space<vmem>>, %arg8: memref<8x128xf32, #tpu.memory_space<vmem>>, %arg9: memref<8x128xf32, #tpu.memory_space<vmem>>) attributes {dimension_semantics = [#tpu.dimension_semantics<parallel>, #tpu.dimension_semantics<arbitrary>], iteration_bounds = array<i64: 1, 1>, scalar_prefetch = 0 : i64, scratch_operands = 1 : i64, tpu.core_type = #tpu.core_type<tc>, window_params = [{transform_indices = @transform_0, window_bounds = array<i64: 8, 128>}, {transform_indices = @transform_1, window_bounds = array<i64: 128, 128>}, {pipeline_mode = #tpu.pipeline_mode<synchronous>, transform_indices = @transform_2, window_bounds = array<i64: 128, 256>}, {pipeline_mode = #tpu.pipeline_mode<synchronous>, transform_indices = @transform_3, window_bounds = array<i64: 1, 256>}, {pipeline_mode = #tpu.pipeline_mode<synchronous>, transform_indices = @transform_4, window_bounds = array<i64: 256, 128>}, {pipeline_mode = #tpu.pipeline_mode<synchronous>, transform_indices = @transform_5, window_bounds = array<i64: 1, 128>}, {transform_indices = @transform_6, window_bounds = array<i64: 8, 128>}]} {
    %c0_i32 = arith.constant 0 : i32
    %0 = arith.cmpi eq, %arg1, %c0_i32 : i32
    %1 = arith.extui %0 : i1 to i32
    %c0_i32_0 = arith.constant 0 : i32
    %2 = arith.cmpi ne, %1, %c0_i32_0 : i32
    scf.if %2 {
      %cst_10 = arith.constant 0.000000e+00 : f32
      %12 = vector.broadcast %cst_10 : f32 to vector<8x128xf32>
      %c0_11 = arith.constant 0 : index
      %c0_12 = arith.constant 0 : index
      %13 = vector.load %arg9[%c0_11, %c0_12] : memref<8x128xf32, #tpu.memory_space<vmem>>, vector<8x128xf32>
      tpu.vector_store %arg9[%c0_11, %c0_12], %12 {strides = array<i32>} : memref<8x128xf32, #tpu.memory_space<vmem>>, vector<8x128xf32>,
    } else {
    }
    %c0 = arith.constant 0 : index
    %c0_1 = arith.constant 0 : index
    %3 = vector.load %arg9[%c0, %c0_1] : memref<8x128xf32, #tpu.memory_space<vmem>>, vector<8x128xf32>
    %c0_2 = arith.constant 0 : index
    %c0_3 = arith.constant 0 : index
    %4 = vector.load %arg2[%c0_2, %c0_3] : memref<8x128xbf16, #tpu.memory_space<vmem>>, vector<8x128xbf16>
    %c0_4 = arith.constant 0 : index
    %c0_5 = arith.constant 0 : index
    %5 = vector.load %arg3[%c0_4, %c0_5] : memref<128x128xbf16, #tpu.memory_space<vmem>>, vector<128x128xbf16>
    %cst = arith.constant dense<0.000000e+00> : vector<8x128xf32>
    %6 = tpu.matmul %4, %5, %cst {dimension_numbers = #tpu.dot_dimension_numbers<[1], [0], [0], [1], [0, 0, 1, 1], [], []>} : vector<8x128xbf16>, vector<128x128xbf16>, vector<8x128xf32> -> vector<8x128xf32>
    %7 = arith.addf %3, %6 : vector<8x128xf32>
    %c0_6 = arith.constant 0 : index
    %c0_7 = arith.constant 0 : index
    %8 = vector.load %arg9[%c0_6, %c0_7] : memref<8x128xf32, #tpu.memory_space<vmem>>, vector<8x128xf32>
    tpu.vector_store %arg9[%c0_6, %c0_7], %7 {strides = array<i32>} : memref<8x128xf32, #tpu.memory_space<vmem>>, vector<8x128xf32>,
    %c0_i32_8 = arith.constant 0 : i32
    %9 = arith.cmpi eq, %arg1, %c0_i32_8 : i32
    %10 = arith.extui %9 : i1 to i32
    %c0_i32_9 = arith.constant 0 : i32
    %11 = arith.cmpi ne, %10, %c0_i32_9 : i32
    scf.if %11 {
      %c0_10 = arith.constant 0 : index
      %c0_11 = arith.constant 0 : index
      %12 = vector.load %arg9[%c0_10, %c0_11] : memref<8x128xf32, #tpu.memory_space<vmem>>, vector<8x128xf32>
      %cst_12 = arith.constant 1.250000e-01 : f32
      %13 = vector.broadcast %cst_12 : f32 to vector<8x128xf32>
      %14 = arith.mulf %12, %13 : vector<8x128xf32>
      %15 = arith.truncf %14 : vector<8x128xf32> to vector<8x128xbf16>
      %c0_13 = arith.constant 0 : index
      %c0_14 = arith.constant 0 : index
      %16 = vector.load %arg4[%c0_13, %c0_14] : memref<128x256xbf16, #tpu.memory_space<vmem>>, vector<128x256xbf16>
      %cst_15 = arith.constant dense<0.000000e+00> : vector<8x256xf32>
      %17 = tpu.matmul %15, %16, %cst_15 {dimension_numbers = #tpu.dot_dimension_numbers<[1], [0], [0], [1], [0, 0, 1, 1], [], []>} : vector<8x128xbf16>, vector<128x256xbf16>, vector<8x256xf32> -> vector<8x256xf32>
      %c0_16 = arith.constant 0 : index
      %c0_17 = arith.constant 0 : index
      %18 = vector.load %arg5[%c0_16, %c0_17] : memref<1x256xf32, #tpu.memory_space<vmem>>, vector<1x256xf32>
      %19 = vector.broadcast %18 : vector<1x256xf32> to vector<8x256xf32>
      %20 = arith.addf %17, %19 : vector<8x256xf32>
      %cst_18 = arith.constant 0.000000e+00 : f32
      %21 = vector.broadcast %cst_18 : f32 to vector<8x256xf32>
      %22 = arith.maximumf %20, %21 : vector<8x256xf32>
      %c0_19 = arith.constant 0 : index
      %c0_20 = arith.constant 0 : index
      %23 = vector.load %arg6[%c0_19, %c0_20] : memref<256x128xf32, #tpu.memory_space<vmem>>, vector<256x128xf32>
      %cst_21 = arith.constant dense<0.000000e+00> : vector<8x128xf32>
      %24 = tpu.matmul %22, %23, %cst_21 {dimension_numbers = #tpu.dot_dimension_numbers<[1], [0], [0], [1], [0, 0, 1, 1], [], []>} : vector<8x256xf32>, vector<256x128xf32>, vector<8x128xf32> -> vector<8x128xf32>
      %c0_22 = arith.constant 0 : index
      %c0_23 = arith.constant 0 : index
      %25 = vector.load %arg7[%c0_22, %c0_23] : memref<1x128xf32, #tpu.memory_space<vmem>>, vector<1x128xf32>
      %26 = vector.broadcast %25 : vector<1x128xf32> to vector<8x128xf32>
      %27 = arith.addf %24, %26 : vector<8x128xf32>
      %28 = tpu.iota {dimensions = array<i32: 1>} : vector<8x128xi32>
      %c2_i32 = arith.constant 2 : i32
      %29 = vector.broadcast %c2_i32 : i32 to vector<8x128xi32>
      %30 = arith.cmpi slt, %28, %29 : vector<8x128xi32>
      %cst_24 = arith.constant -1.000000e+30 : f32
      %31 = vector.broadcast %cst_24 : f32 to vector<8x128xf32>
      %32 = arith.select %30, %27, %31 : vector<8x128xi1>, vector<8x128xf32>
      %cst_25 = arith.constant dense<0xFF800000> : vector<8xf32>
      %33 = vector.multi_reduction <maximumf>, %32, %cst_25 [1] : vector<8x128xf32> to vector<8xf32>
      %34 = vector.shape_cast %33 : vector<8xf32> to vector<8x1xf32>
      %35 = vector.broadcast %34 : vector<8x1xf32> to vector<8x128xf32>
      %36 = arith.subf %32, %35 : vector<8x128xf32>
      %37 = math.exp %36 : vector<8x128xf32>
      %cst_26 = arith.constant dense<0.000000e+00> : vector<8xf32>
      %38 = vector.multi_reduction <add>, %37, %cst_26 [1] : vector<8x128xf32> to vector<8xf32>
      %39 = vector.shape_cast %38 : vector<8xf32> to vector<8x1xf32>
      %40 = math.log %39 : vector<8x1xf32>
      %41 = vector.broadcast %40 : vector<8x1xf32> to vector<8x128xf32>
      %42 = arith.subf %36, %41 : vector<8x128xf32>
      %c0_27 = arith.constant 0 : index
      %c0_28 = arith.constant 0 : index
      %43 = vector.load %arg8[%c0_27, %c0_28] : memref<8x128xf32, #tpu.memory_space<vmem>>, vector<8x128xf32>
      tpu.vector_store %arg8[%c0_27, %c0_28], %42 {strides = array<i32>} : memref<8x128xf32, #tpu.memory_space<vmem>>, vector<8x128xf32>,
    } else {
    }
    return
  }
  func.func @transform_0(%arg0: i32, %arg1: i32) -> (i32, i32) {
    %c0_i32 = arith.constant 0 : i32
    return %arg0, %arg1 : i32, i32
  }
  func.func @transform_1(%arg0: i32, %arg1: i32) -> (i32, i32) {
    %c0_i32 = arith.constant 0 : i32
    %c0_i32_0 = arith.constant 0 : i32
    return %arg1, %c0_i32 : i32, i32
  }
  func.func @transform_2(%arg0: i32, %arg1: i32) -> (i32, i32) {
    %c0_i32 = arith.constant 0 : i32
    %c0_i32_0 = arith.constant 0 : i32
    %c0_i32_1 = arith.constant 0 : i32
    return %c0_i32, %c0_i32_0 : i32, i32
  }
  func.func @transform_3(%arg0: i32, %arg1: i32) -> (i32, i32) {
    %c0_i32 = arith.constant 0 : i32
    %c0_i32_0 = arith.constant 0 : i32
    %c0_i32_1 = arith.constant 0 : i32
    return %c0_i32, %c0_i32_0 : i32, i32
  }
  func.func @transform_4(%arg0: i32, %arg1: i32) -> (i32, i32) {
    %c0_i32 = arith.constant 0 : i32
    %c0_i32_0 = arith.constant 0 : i32
    %c0_i32_1 = arith.constant 0 : i32
    return %c0_i32, %c0_i32_0 : i32, i32
  }
  func.func @transform_5(%arg0: i32, %arg1: i32) -> (i32, i32) {
    %c0_i32 = arith.constant 0 : i32
    %c0_i32_0 = arith.constant 0 : i32
    %c0_i32_1 = arith.constant 0 : i32
    return %c0_i32, %c0_i32_0 : i32, i32
  }
  func.func @transform_6(%arg0: i32, %arg1: i32) -> (i32, i32) {
    %c0_i32 = arith.constant 0 : i32
    %c0_i32_0 = arith.constant 0 : i32
    return %arg0, %c0_i32 : i32, i32
  }
}

</mosaic_0001>

<bundles_post_ra>
// kernel: tpu_custom_call.1
= control target key start
LH: loop header
LB: loop body
LE: loop exit
PB: predicated region body
PF: predicated region fallthrough
CT: control target
= control target key end

     0   :  { %11 = vsyncpa [#allocation4], 0  ;;  %s981_s0 = inlined_call_operand.hbm [shape: bf16[8,128], index: 0, kind: input, shape index: {}]   ;;  %s982_s1 = inlined_call_operand.hbm [shape: bf16[128,128], index: 1, kind: input, shape index: {}]   ;;  %s983_s2 = inlined_call_operand.hbm [shape: bf16[128,256], index: 2, kind: input, shape index: {}]   ;;  %s984_s3 = inlined_call_operand.hbm [shape: f32[1,256], index: 3, kind: input, shape index: {}]   ;;  %s985_s4 = inlined_call_operand.hbm [shape: f32[256,128], index: 4, kind: input, shape index: {}]   ;;  %s986_s5 = inlined_call_operand.hbm [shape: f32[1,128], index: 5, kind: input, shape index: {}]   ;;  %s987_s6 = inlined_call_operand.hbm [shape: f32[8,128], index: 6, kind: output, shape index: {}]  }
   0x1   :  { %12 = vsyncpa [#allocation7], 0 }
   0x2   :  { %13 = vsyncpa [#allocation10], 0 }
   0x3   :  { %14 = vsyncpa [#allocation13], 0 }
   0x4   :  { %15 = vsyncpa [#allocation5], 0  ;;  %s848_s21 = smov [#allocation6]   ;;  %s684_s25 = scalar_lea.hbm %s982_s1, 1024 }
   0x5   :  { %s31_s22 = sshll.u32 %s848_s21, 4  ;;  %p685_p0 = scmp.ne.s32.totalorder %s982_s1, %s684_s25  ;;  %s32_s22 = int_to_ptr.vmem [resolvable:$true] %s31_s22 }
   0x6   :  { %p688_p1 = scmp.lt.u32.totalorder %s684_s25, %s982_s1 }
   0x8   :  { %p690_p2 = pnand %p688_p1, %p685_p0 }
   0xa   :  { %693 = shalt.err (!%p690_p2)
}
   0xb   :  { %s694_s30 = scalar_lea.vmem %s32_s22, 1024  ;;  %p699_p4 = scmp.lt.s32.totalorder %s32_s22, %s32_s22 }
   0xc   :  { %p695_p3 = scmp.ne.s32.totalorder %s32_s22, %s694_s30  ;;  %p700_p5 = scmp.lt.s32.totalorder %s694_s30, %s694_s30 }
   0xe   :  { %p701_p6 = por %p700_p5, %p699_p4 }
  0x10   :  { %p702_p7 = pnand %p701_p6, %p695_p3 }
  0x12   :  { %705 = shalt.err (!%p702_p7)
}
  0x13   :  { %s849_s7 = smov 64   ;;  %s850_s8 = smov 4  }
  0x14   :  { %37 = dma.hbm_to_vmem [thread:$0]  %s982_s1, 1024, %s32_s22, [#allocation7], %s849_s7, %s849_s7, %s850_s8  }
  0x15   :  { %s851_s11 = smov [#allocation9]   ;;  %s852_s13 = smov [#allocation3]  }
  0x16   :  { %s56_s12 = sshll.u32 %s851_s11, 4  ;;  %s22_s14 = sshll.u32 %s852_s13, 4  ;;  %s57_s12 = int_to_ptr.vmem [resolvable:$true] %s56_s12  ;;  %s23_s14 = int_to_ptr.vmem [resolvable:$true] %s22_s14 }
  0x17   :  { %s706_s17 = scalar_lea.hbm %s984_s3, 32 }
  0x18   :  { %p707_p8 = scmp.ne.s32.totalorder %s984_s3, %s706_s17  ;;  %p710_p9 = scmp.lt.u32.totalorder %s706_s17, %s984_s3 }
  0x1a   :  { %p712_p10 = pnand %p710_p9, %p707_p8 }
  0x1c   :  { %715 = shalt.err (!%p712_p10)
}
  0x1d   :  { %s716_s1 = scalar_lea.vmem %s57_s12, 32  ;;  %p721_p12 = scmp.lt.s32.totalorder %s57_s12, %s57_s12 }
  0x1e   :  { %p717_p11 = scmp.ne.s32.totalorder %s57_s12, %s716_s1  ;;  %p722_p13 = scmp.lt.s32.totalorder %s716_s1, %s716_s1 }
  0x20   :  { %p723_p0 = por %p722_p13, %p721_p12 }
  0x22   :  { %p724_p1 = pnand %p723_p0, %p717_p11 }
  0x24   :  { %727 = shalt.err (!%p724_p1)
}
  0x25   :  { %59 = dma.hbm_to_vmem [thread:$0]  %s984_s3, 32, %s57_s12, [#allocation10]  }
  0x26   :  { %s728_s26 = scalar_lea.hbm %s981_s0, 64 }
  0x27   :  { %p729_p2 = scmp.ne.s32.totalorder %s981_s0, %s728_s26  ;;  %p732_p3 = scmp.lt.u32.totalorder %s728_s26, %s981_s0 }
  0x29   :  { %p734_p4 = pnand %p732_p3, %p729_p2 }
  0x2b   :  { %737 = shalt.err (!%p734_p4)
}
  0x2c   :  { %s738_s7 = scalar_lea.vmem %s23_s14, 64  ;;  %p743_p6 = scmp.lt.s32.totalorder %s23_s14, %s23_s14 }
  0x2d   :  { %p739_p5 = scmp.ne.s32.totalorder %s23_s14, %s738_s7  ;;  %p744_p7 = scmp.lt.s32.totalorder %s738_s7, %s738_s7 }
  0x2f   :  { %p745_p8 = por %p744_p7, %p743_p6 }
  0x31   :  { %p746_p9 = pnand %p745_p8, %p739_p5 }
  0x33   :  { %749 = shalt.err (!%p746_p9)
}
  0x34   :  { %25 = dma.hbm_to_vmem [thread:$0]  %s981_s0, 64, %s23_s14, [#allocation4]  }
  0x35   :  { %s853_s9 = smov [#allocation8]   ;;  %s750_s13 = scalar_lea.hbm %s983_s2, 2048 }
  0x36   :  { %s43_s10 = sshll.u32 %s853_s9, 4  ;;  %p751_p10 = scmp.ne.s32.totalorder %s983_s2, %s750_s13  ;;  %s44_s10 = int_to_ptr.vmem [resolvable:$true] %s43_s10 }
  0x37   :  { %p754_p11 = scmp.lt.u32.totalorder %s750_s13, %s983_s2 }
  0x39   :  { %p756_p12 = pnand %p754_p11, %p751_p10 }
  0x3b   :  { %759 = shalt.err (!%p756_p12)
}
  0x3c   :  { %s760_s19 = scalar_lea.vmem %s44_s10, 2048  ;;  %p765_p0 = scmp.lt.s32.totalorder %s44_s10, %s44_s10 }
  0x3d   :  { %p761_p13 = scmp.ne.s32.totalorder %s44_s10, %s760_s19  ;;  %p766_p1 = scmp.lt.s32.totalorder %s760_s19, %s760_s19 }
  0x3f   :  { %p767_p2 = por %p766_p1, %p765_p0 }
  0x41   :  { %p768_p3 = pnand %p767_p2, %p761_p13 }
  0x43   :  { %771 = shalt.err (!%p768_p3)
}
  0x44   :  { %s854_s0 = smov 128   ;;  %s855_s14 = smov 8  }
  0x45   :  { %49 = dma.hbm_to_vmem [thread:$0]  %s983_s2, 2048, %s44_s10, [#allocation7], %s854_s0, %s854_s0, %s855_s14  }
  0x46   :  { %s856_s1 = smov [#allocation11]   ;;  %s857_s23 = smov [#allocation12]  }
  0x47   :  { %s65_s22 = sshll.u32 %s856_s1, 4  ;;  %s78_s24 = sshll.u32 %s857_s23, 4  ;;  %s66_s22 = int_to_ptr.vmem [resolvable:$true] %s65_s22  ;;  %s79_s24 = int_to_ptr.vmem [resolvable:$true] %s78_s24 }
  0x48   :  { %s772_s27 = scalar_lea.hbm %s985_s4, 4096 }
  0x49   :  { %p773_p4 = scmp.ne.s32.totalorder %s985_s4, %s772_s27  ;;  %p776_p5 = scmp.lt.u32.totalorder %s772_s27, %s985_s4 }
  0x4b   :  { %p778_p6 = pnand %p776_p5, %p773_p4 }
  0x4d   :  { %781 = shalt.err (!%p778_p6)
}
  0x4e   :  { %s782_s2 = scalar_lea.vmem %s66_s22, 4096  ;;  %p787_p8 = scmp.lt.s32.totalorder %s66_s22, %s66_s22 }
  0x4f   :  { %p783_p7 = scmp.ne.s32.totalorder %s66_s22, %s782_s2  ;;  %p788_p9 = scmp.lt.s32.totalorder %s782_s2, %s782_s2 }
  0x51   :  { %p789_p10 = por %p788_p9, %p787_p8 }
  0x53   :  { %p790_p11 = pnand %p789_p10, %p783_p7 }
  0x55   :  { %793 = shalt.err (!%p790_p11)
}
  0x56   :  { %71 = dma.hbm_to_vmem [thread:$0]  %s985_s4, 4096, %s66_s22, [#allocation10], %s854_s0, %s854_s0, %s855_s14  }
  0x57   :  { %s794_s11 = scalar_lea.hbm %s986_s5, 16 }
  0x58   :  { %p795_p12 = scmp.ne.s32.totalorder %s986_s5, %s794_s11  ;;  %p798_p13 = scmp.lt.u32.totalorder %s794_s11, %s986_s5 }
  0x5a   :  { %p800_p0 = pnand %p798_p13, %p795_p12 }
  0x5c   :  { %803 = shalt.err (!%p800_p0)
}
  0x5d   :  { %s804_s17 = scalar_lea.vmem %s79_s24, 16  ;;  %s808_s18 = scalar_lea.vmem %s79_s24, 32 }
  0x5e   :  { %p805_p1 = scmp.ne.s32.totalorder %s79_s24, %s804_s17  ;;  %p809_p2 = scmp.lt.s32.totalorder %s79_s24, %s79_s24 }
  0x5f   :  { %p810_p3 = scmp.lt.s32.totalorder %s808_s18, %s804_s17 }
  0x61   :  { %p811_p4 = por %p810_p3, %p809_p2 }
  0x63   :  { %p812_p5 = pnand %p811_p4, %p805_p1 }
  0x65   :  { %815 = shalt.err (!%p812_p5)
}
  0x66   :  { %81 = dma.hbm_to_vmem [thread:$0]  %s986_s5, 16, %s79_s24, [#allocation13]  }
  0x67   :  { %838 = dma.done.wait [#allocation4], 64  }
  0x68   :  { %839 = vsyncadd [#allocation4], 4294967232 }
  0x69   :  { %840 = dma.done.wait [#allocation7], 3072  }
  0x6a   :  { %841 = vsyncadd [#allocation7], 4294964224 }
  0x6b   :  { %842 = dma.done.wait [#allocation10], 4128  }
  0x6c   :  { %843 = vsyncadd [#allocation10], 4294963168 }
  0x6d   :  { %844 = dma.done.wait [#allocation13], 16  }
  0x6e   :  { %845 = vsyncadd [#allocation13], 4294967280  ;;  %v858_v0 = vmov 0.0   ;;  %vm859_vm0 = vmmov 0   ;;  %v648_v1 = vld [vmem:[#allocation6] sm:$0xff]   ;;  %v649_v2 = vld [vmem:[#allocation6 + $0x8] sm:$0xff]  }
  0x6f   :  { %582 = vmatprep.subr.bf16.mxu0 %v858_v0  ;;  %598 = vmatprep.mubr.msk.bf16.mxu0 %vm859_vm0, %v858_v0  ;;  %v650_v3 = vld [vmem:[#allocation6 + $0x10] sm:$0xff]   ;;  %v656_v4 = vld [vmem:[#allocation8 + $0x4] ss:$8 sps:$4 sm:$0xff]   ;;  %v658_v5 = vld [vmem:[#allocation8] ss:$8 sps:$4 sm:$0xff]   ;;  %v860_v26 = vmov 0  }
  0x70   :  { %583 = vmatpush3.bf16.msra.mxu0 %v648_v1  ;;  %v651_v6 = vld [vmem:[#allocation6 + $0x18] sm:$0xff]   ;;  %328 = vmatprep.subr.bf16.mxu1 %v656_v4  ;;  %v662_v9 = vld [vmem:[#allocation8 + $0x24] ss:$8 sps:$4 sm:$0xff]   ;;  %v664_v11 = vld [vmem:[#allocation8 + $0x20] ss:$8 sps:$4 sm:$0xff]   ;;  %s861_s5 = smov [#allocation14]  }
  0x71   :  { %584 = vmatprep.subr.bf16.mxu0 %v858_v0  ;;  %v659_v7 = vld [vmem:[#allocation8 + $0x14] ss:$8 sps:$4 sm:$0xff]   ;;  %329 = vmatpush1.bf16.msra.mxu1 %v658_v5  ;;  %v661_v8 = vld [vmem:[#allocation8 + $0x10] ss:$8 sps:$4 sm:$0xff]   ;;  %v652_v10 = vld [vmem:[#allocation6 + $0x20] sm:$0xff]   ;;  %s501_s0 = sshll.u32 %s861_s5, 4  ;;  %s502_s0 = int_to_ptr.vmem [resolvable:$true] %s501_s0 }
  0x72   :  { %330 = vmatprep.subr.bf16.mxu1 %v659_v7  ;;  %v665_v12 = vld [vmem:[#allocation8 + $0x34] ss:$8 sps:$4 sm:$0xff]   ;;  %v653_v13 = vld [vmem:[#allocation6 + $0x28] sm:$0xff]   ;;  %v667_v14 = vld [vmem:[#allocation8 + $0x30] ss:$8 sps:$4 sm:$0xff]   ;;  %360 = vmatprep.mubr.bf16.mxu1 %v860_v26  ;;  %s816_s14 = scalar_lea.vmem %s502_s0, 128  ;;  %p821_p7 = scmp.lt.s32.totalorder %s502_s0, %s502_s0 }
  0x73   :  { %v668_v15 = vld [vmem:[#allocation8 + $0x44] ss:$8 sps:$4 sm:$0xff]   ;;  %v654_v16 = vld [vmem:[#allocation6 + $0x30] sm:$0xff]   ;;  %v670_v17 = vld [vmem:[#allocation8 + $0x40] ss:$8 sps:$4 sm:$0xff]   ;;  %p817_p6 = scmp.ne.s32.totalorder %s502_s0, %s816_s14  ;;  %p822_p8 = scmp.lt.s32.totalorder %s816_s14, %s816_s14 }
  0x74   :  { %585 = vmatpush3.bf16.msra.mxu0 %v649_v2  ;;  %v671_v18 = vld [vmem:[#allocation8 + $0x54] ss:$8 sps:$4 sm:$0xff]   ;;  %v673_v20 = vld [vmem:[#allocation8 + $0x50] ss:$8 sps:$4 sm:$0xff]   ;;  %v674_v21 = vld [vmem:[#allocation8 + $0x64] ss:$8 sps:$4 sm:$0xff]  }
  0x75   :  { %586 = vmatprep.subr.bf16.mxu0 %v858_v0  ;;  %331 = vmatpush1.bf16.msra.mxu1 %v661_v8  ;;  %v655_v19 = vld [vmem:[#allocation6 + $0x38] sm:$0xff]   ;;  %v676_v23 = vld [vmem:[#allocation8 + $0x60] ss:$8 sps:$4 sm:$0xff]   ;;  %p823_p9 = por %p822_p8, %p821_p7 }
  0x76   :  { %332 = vmatprep.subr.bf16.mxu1 %v662_v9  ;;  %v107_v22 = vld [vmem:[#allocation3] sm:$0xf]  ;;  %v679_v25 = vld [vmem:[#allocation8 + $0x70] ss:$8 sps:$4 sm:$0xff]   ;;  %v387_v27 = vld [vmem:[#allocation11 + $0x80] sm:$0xff] }
  0x77   :  { %v677_v24 = vld [vmem:[#allocation8 + $0x74] ss:$8 sps:$4 sm:$0xff]   ;;  %v388_v28 = vld [vmem:[#allocation11 + $0x88] sm:$0xff]  ;;  %v371_v29 = vld [vmem:[#allocation11] sm:$0xff]  ;;  %p824_p10 = pnand %p823_p9, %p817_p6 }
  0x78   :  { %587 = vmatpush3.bf16.msra.mxu0 %v650_v3  ;;  %v602_v30 = vpack.c.bf16 %v388_v28, %v387_v27  ;;  %v372_v31 = vld [vmem:[#allocation11 + $0x8] sm:$0xff]  ;;  %v389_v32 = vld [vmem:[#allocation11 + $0x90] sm:$0xff]  ;;  %v390_v33 = vld [vmem:[#allocation11 + $0x98] sm:$0xff] }
  0x79   :  { %588 = vmatprep.subr.bf16.mxu0 %v858_v0  ;;  %333 = vmatpush1.bf16.msra.mxu1 %v664_v11  ;;  %v604_v34 = vpack.c.bf16 %v372_v31, %v371_v29  ;;  %v606_v35 = vpack.c.bf16 %v390_v33, %v389_v32  ;;  %v373_v36 = vld [vmem:[#allocation11 + $0x10] sm:$0xff]  ;;  %v374_v37 = vld [vmem:[#allocation11 + $0x18] sm:$0xff]  ;;  %v391_v38 = vld [vmem:[#allocation11 + $0xa0] sm:$0xff] }
  0x7a   :  { %334 = vmatprep.subr.bf16.mxu1 %v665_v12  ;;  %v392_v39 = vld [vmem:[#allocation11 + $0xa8] sm:$0xff]  ;;  %v608_v40 = vpack.c.bf16 %v374_v37, %v373_v36  ;;  %v375_v42 = vld [vmem:[#allocation11 + $0x20] sm:$0xff]  ;;  %v393_v44 = vld [vmem:[#allocation11 + $0xb0] sm:$0xff] }
  0x7b   :  { %v610_v41 = vpack.c.bf16 %v392_v39, %v391_v38  ;;  %v376_v43 = vld [vmem:[#allocation11 + $0x28] sm:$0xff]  ;;  %v394_v45 = vld [vmem:[#allocation11 + $0xb8] sm:$0xff]  ;;  %v377_v48 = vld [vmem:[#allocation11 + $0x30] sm:$0xff] }
  0x7c   :  { %589 = vmatpush3.bf16.msra.mxu0 %v651_v6  ;;  %v612_v46 = vpack.c.bf16 %v376_v43, %v375_v42  ;;  %v614_v47 = vpack.c.bf16 %v394_v45, %v393_v44  ;;  %v378_v49 = vld [vmem:[#allocation11 + $0x38] sm:$0xff]  ;;  %v395_v50 = vld [vmem:[#allocation11 + $0xc0] sm:$0xff]  ;;  %v396_v51 = vld [vmem:[#allocation11 + $0xc8] sm:$0xff] }
  0x7d   :  { %590 = vmatprep.subr.bf16.mxu0 %v858_v0  ;;  %335 = vmatpush1.bf16.msra.mxu1 %v667_v14  ;;  %v616_v52 = vpack.c.bf16 %v378_v49, %v377_v48  ;;  %v618_v53 = vpack.c.bf16 %v396_v51, %v395_v50  ;;  %v379_v54 = vld [vmem:[#allocation11 + $0x40] sm:$0xff]  ;;  %v380_v55 = vld [vmem:[#allocation11 + $0x48] sm:$0xff]  ;;  %v397_v56 = vld [vmem:[#allocation11 + $0xd0] sm:$0xff] }
  0x7e   :  { %336 = vmatprep.subr.bf16.mxu1 %v668_v15  ;;  %v398_v57 = vld [vmem:[#allocation11 + $0xd8] sm:$0xff]  ;;  %v620_v58 = vpack.c.bf16 %v380_v55, %v379_v54  ;;  %v381_v60 = vld [vmem:[#allocation11 + $0x50] sm:$0xff]  ;;  %v399_v62 = vld [vmem:[#allocation11 + $0xe0] sm:$0xff] }
  0x7f   :  { %v622_v59 = vpack.c.bf16 %v398_v57, %v397_v56  ;;  %v382_v61 = vld [vmem:[#allocation11 + $0x58] sm:$0xff]  ;;  %v400_v63 = vld [vmem:[#allocation11 + $0xe8] sm:$0xff]  ;;  %v383_v8 = vld [vmem:[#allocation11 + $0x60] sm:$0xff] }
  0x80   :  { %591 = vmatpush3.bf16.msra.mxu0 %v652_v10  ;;  %v626_v1 = vpack.c.bf16 %v400_v63, %v399_v62  ;;  %v384_v9 = vld [vmem:[#allocation11 + $0x68] sm:$0xff]  ;;  %v401_v11 = vld [vmem:[#allocation11 + $0xf0] sm:$0xff]  ;;  %v402_v12 = vld [vmem:[#allocation11 + $0xf8] sm:$0xff] }
  0x81   :  { %592 = vmatprep.subr.bf16.mxu0 %v858_v0  ;;  %337 = vmatpush1.bf16.msra.mxu1 %v670_v17  ;;  %v628_v10 = vpack.c.bf16 %v384_v9, %v383_v8  ;;  %v385_v14 = vld [vmem:[#allocation11 + $0x70] sm:$0xff]  ;;  %v386_v15 = vld [vmem:[#allocation11 + $0x78] sm:$0xff]  ;;  %v238_v17 = vlaneseq }
  0x82   :  { %338 = vmatprep.subr.bf16.mxu1 %v671_v18 }
  0x83   :  { %v239_v18 = vshrl.u32 %v238_v17, 7  ;;  %v481_v32 = vand.u32 127, %v238_v17 }
  0x84   :  { %593 = vmatpush3.bf16.msra.mxu0 %v653_v13  ;;  %v630_v13 = vpack.c.bf16 %v402_v12, %v401_v11 }
  0x85   :  { %594 = vmatprep.subr.bf16.mxu0 %v858_v0  ;;  %339 = vmatpush1.bf16.msra.mxu1 %v673_v20  ;;  %v236_v20 = vld [vmem:[#allocation9] sm:$0x3]  ;;  %vm482_vm1 = vcmp.lt.s32.totalorder %v481_v32, 2 }
  0x86   :  { %340 = vmatprep.subr.bf16.mxu1 %v674_v21  ;;  %v244_v21 = vsub.s32 1, %v239_v18 }
  0x88   :  { %595 = vmatpush3.bf16.msra.mxu0 %v654_v16  ;;  %v632_v16 = vpack.c.bf16 %v386_v15, %v385_v14 }
  0x89   :  { %596 = vmatprep.subr.bf16.mxu0 %v858_v0  ;;  %341 = vmatpush1.bf16.msra.mxu1 %v676_v23  ;;  %v624_v0 = vpack.c.bf16 %v382_v61, %v381_v60  ;;  %v245_v23 = vrot.slane %v236_v20, %v244_v21 }
  0x8a   :  { %342 = vmatprep.subr.bf16.mxu1 %v677_v24 }
  0x8c   :  { %597 = vmatpush3.bf16.msra.mxu0 %v655_v19  ;;  %v240_v19 = vsub.s32 0, %v239_v18 }
  0x8d   :  { %343 = vmatpush1.bf16.msra.mxu1 %v679_v25  ;;  %603 = vmatprep.subr.bf16.mxu0 %v602_v30 }
  0x8f   :  { %599 = vmatmul.mubr.bf16.vlgmr.msra.gmra.mrb[0].mxu0 %v107_v22  ;;  %v241_v22 = vrot.slane %v236_v20, %v240_v19 }
  0x90   :  { %605 = vmatpush3.bf16.msra.mxu0 %v604_v34 }
  0x91   :  { %607 = vmatprep.subr.bf16.mxu0 %v606_v35  ;;  %v537_v35 = vld [vmem:[#allocation12] ss:$0 sm:$0xff] }
  0x94   :  { %609 = vmatpush3.bf16.msra.mxu0 %v608_v40 }
  0x95   :  { %611 = vmatprep.subr.bf16.mxu0 %v610_v41 }
  0x98   :  { %613 = vmatpush3.bf16.msra.mxu0 %v612_v46 }
  0x99   :  { %615 = vmatprep.subr.bf16.mxu0 %v614_v47 }
  0x9c   :  { %617 = vmatpush3.bf16.msra.mxu0 %v616_v52 }
  0x9d   :  { %619 = vmatprep.subr.bf16.mxu0 %v618_v53 }
  0xa0   :  { %621 = vmatpush3.bf16.msra.mxu0 %v620_v58 }
  0xa1   :  { %623 = vmatprep.subr.bf16.mxu0 %v622_v59 }
  0xa4   :  { %625 = vmatpush3.bf16.msra.mxu0 %v624_v0 }
  0xa5   :  { %627 = vmatprep.subr.bf16.mxu0 %v626_v1 }
  0xa8   :  { %629 = vmatpush3.bf16.msra.mxu0 %v628_v10 }
  0xa9   :  { %631 = vmatprep.subr.bf16.mxu0 %v630_v13 }
  0xac   :  { %633 = vmatpush3.bf16.msra.mxu0 %v632_v16 }
 0x162   :  { %v206_v2 = vpop.f32.mrb[0].mxu0 }
 0x163   :  { %v218_v3 = vmul.f32 0.125, %v206_v2  ;;  %v600_v4 = vpop.f32.mrb[1].mxu0 }
 0x164   :  { %v209_v5 = vpop.f32.mrb[2].mxu0 }
 0x165   :  { %v219_v6 = vpack.c.bf16 %v218_v3, %v218_v3  ;;  %v601_v7 = vpop.f32.mrb[3].mxu0 }
 0x167   :  { %361 = vmatmul.mubr.bf16.vlgmr.msra.gmra.mrb[0].mxu1 %v219_v6 }
 0x23a   :  { %v362_v24 = vpop.f32.mrb[0].mxu1 }
 0x23b   :  { %v363_v25 = vadd.f32 %v362_v24, %v241_v22  ;;  %v364_v26 = vpop.f32.mrb[1].mxu1 }
 0x23c   :  { %v365_v27 = vadd.f32 %v364_v26, %v245_v23  ;;  %v366_v28 = vpop.f32.mrb[2].mxu1 }
 0x23d   :  { %v367_v29 = vpop.f32.mrb[3].mxu1  ;;  %v369_v31 = vmax.f32 %v363_v25, 0.0 }
 0x23e   :  { %v370_v30 = vmax.f32 %v365_v27, 0.0 }
 0x240   :  { %474 = vmatprep.mubr.f32.mxu0 %v370_v30 }
 0x241   :  { %475 = vmatmul.mubr.f32.vlgmr.msra.gmra.mrb[4].mxu0 %v369_v31 }
 0x314   :  { %v579_v33 = vpop.f32.mrb[4].mxu0 }
 0x315   :  { %v580_v34 = vpop.f32.mrb[5].mxu0 }
 0x316   :  { %v581_v36 = vadd.f32 %v580_v34, %v579_v33 }
 0x318   :  { %v477_v37 = vadd.f32 %v581_v36, %v537_v35 }
 0x31a   :  { %v483_v38 = vsel %vm482_vm1, %v477_v37, -1e+30 }
 0x31b   :  { %484 = vmax.xlane.f32.xlu0 %v483_v38 }
 0x3a8   :  { %v485_v39 = vpop.xlane.xlu0 %484 }
 0x3a9   :  { %v486_v40 = vsub.f32 %v483_v38, %v485_v39 }
 0x3ab   :  { %v487_v41 = vmul.f32 1.442695, %v486_v40 }
 0x3ad   :  { %680 = vpow2.f32 %v487_v41 }
 0x3b7   :  { %v681_v42 = vpop.eup %680 }
 0x3b8   :  { %489 = vadd.xlane.f32.xlu0 %v681_v42 }
 0x445   :  { %v490_v43 = vpop.xlane.xlu0 %489 }
 0x446   :  { %682 = vlog2.f32 %v490_v43 }
 0x450   :  { %v683_v44 = vpop.eup %682 }
 0x451   :  { %v492_v45 = vmul.f32 0.6931472, %v683_v44 }
 0x453   :  { %v493_v46 = vsub.f32 %v486_v40, %v492_v45 }
 0x455   :  { %494 = vst [vmem:[#allocation14] sm:$0xff] %v493_v46 }
 0x456   :  { %827 = shalt.err (!%p824_p10)
}
 0x457   :  { %s828_s1 = scalar_lea.hbm %s987_s6, 128 }
 0x458   :  { %p829_p11 = scmp.ne.s32.totalorder %s987_s6, %s828_s1  ;;  %p832_p12 = scmp.lt.u32.totalorder %s828_s1, %s987_s6 }
 0x45a   :  { %p834_p13 = pnand %p832_p12, %p829_p11 }
 0x45c   :  { %837 = shalt.err (!%p834_p13)
}
 0x45d   :  { %504 = dma.vmem_to_hbm [thread:$0]  %s502_s0, 128, %s987_s6, [#allocation5]  }
 0x45e   :  { %846 = dma.done.wait [#allocation5], 128  }
 0x45f   :  { %847 = vsyncadd [#allocation5], 4294967168 }
 0x460   :  { %508 = vsyncpa [#allocation4], 1 }
 0x461   :  { %509 = vsyncpa [#allocation7], 1 }
 0x462   :  { %510 = vsyncpa [#allocation10], 1 }
 0x463   :  { %511 = vsyncpa [#allocation13], 1 }
 0x464   :  { %512 = vsyncpa [#allocation5], 1 }

// kernel: tpu_custom_call.1
= control target key start
LH: loop header
LB: loop body
LE: loop exit
PB: predicated region body
PF: predicated region fallthrough
CT: control target
= control target key end

     0   :  { %11 = vsyncpa [#allocation4], 0  ;;  %s981_s0 = inlined_call_operand.hbm [shape: bf16[8,128], index: 0, kind: input, shape index: {}]   ;;  %s982_s1 = inlined_call_operand.hbm [shape: bf16[128,128], index: 1, kind: input, shape index: {}]   ;;  %s983_s2 = inlined_call_operand.hbm [shape: bf16[128,256], index: 2, kind: input, shape index: {}]   ;;  %s984_s3 = inlined_call_operand.hbm [shape: f32[1,256], index: 3, kind: input, shape index: {}]   ;;  %s985_s4 = inlined_call_operand.hbm [shape: f32[256,128], index: 4, kind: input, shape index: {}]   ;;  %s986_s5 = inlined_call_operand.hbm [shape: f32[1,128], index: 5, kind: input, shape index: {}]   ;;  %s987_s6 = inlined_call_operand.hbm [shape: f32[8,128], index: 6, kind: output, shape index: {}]  }
   0x1   :  { %12 = vsyncpa [#allocation7], 0 }
   0x2   :  { %13 = vsyncpa [#allocation10], 0 }
   0x3   :  { %14 = vsyncpa [#allocation13], 0 }
   0x4   :  { %15 = vsyncpa [#allocation5], 0  ;;  %s848_s21 = smov [#allocation6]   ;;  %s684_s25 = scalar_lea.hbm %s982_s1, 1024 }
   0x5   :  { %s31_s22 = sshll.u32 %s848_s21, 4  ;;  %p685_p0 = scmp.ne.s32.totalorder %s982_s1, %s684_s25  ;;  %s32_s22 = int_to_ptr.vmem [resolvable:$true] %s31_s22 }
   0x6   :  { %p688_p1 = scmp.lt.u32.totalorder %s684_s25, %s982_s1 }
   0x8   :  { %p690_p2 = pnand %p688_p1, %p685_p0 }
   0xa   :  { %693 = shalt.err (!%p690_p2)
}
   0xb   :  { %s694_s30 = scalar_lea.vmem %s32_s22, 1024  ;;  %p699_p4 = scmp.lt.s32.totalorder %s32_s22, %s32_s22 }
   0xc   :  { %p695_p3 = scmp.ne.s32.totalorder %s32_s22, %s694_s30  ;;  %p700_p5 = scmp.lt.s32.totalorder %s694_s30, %s694_s30 }
   0xe   :  { %p701_p6 = por %p700_p5, %p699_p4 }
  0x10   :  { %p702_p7 = pnand %p701_p6, %p695_p3 }
  0x12   :  { %705 = shalt.err (!%p702_p7)
}
  0x13   :  { %s849_s7 = smov 64   ;;  %s850_s8 = smov 4  }
  0x14   :  { %37 = dma.hbm_to_vmem [thread:$0]  %s982_s1, 1024, %s32_s22, [#allocation7], %s849_s7, %s849_s7, %s850_s8  }
  0x15   :  { %s851_s11 = smov [#allocation9]   ;;  %s852_s13 = smov [#allocation3]  }
  0x16   :  { %s56_s12 = sshll.u32 %s851_s11, 4  ;;  %s22_s14 = sshll.u32 %s852_s13, 4  ;;  %s57_s12 = int_to_ptr.vmem [resolvable:$true] %s56_s12  ;;  %s23_s14 = int_to_ptr.vmem [resolvable:$true] %s22_s14 }
  0x17   :  { %s706_s17 = scalar_lea.hbm %s984_s3, 32 }
  0x18   :  { %p707_p8 = scmp.ne.s32.totalorder %s984_s3, %s706_s17  ;;  %p710_p9 = scmp.lt.u32.totalorder %s706_s17, %s984_s3 }
  0x1a   :  { %p712_p10 = pnand %p710_p9, %p707_p8 }
  0x1c   :  { %715 = shalt.err (!%p712_p10)
}
  0x1d   :  { %s716_s1 = scalar_lea.vmem %s57_s12, 32  ;;  %p721_p12 = scmp.lt.s32.totalorder %s57_s12, %s57_s12 }
  0x1e   :  { %p717_p11 = scmp.ne.s32.totalorder %s57_s12, %s716_s1  ;;  %p722_p13 = scmp.lt.s32.totalorder %s716_s1, %s716_s1 }
  0x20   :  { %p723_p0 = por %p722_p13, %p721_p12 }
  0x22   :  { %p724_p1 = pnand %p723_p0, %p717_p11 }
  0x24   :  { %727 = shalt.err (!%p724_p1)
}
  0x25   :  { %59 = dma.hbm_to_vmem [thread:$0]  %s984_s3, 32, %s57_s12, [#allocation10]  }
  0x26   :  { %s728_s26 = scalar_lea.hbm %s981_s0, 64 }
  0x27   :  { %p729_p2 = scmp.ne.s32.totalorder %s981_s0, %s728_s26  ;;  %p732_p3 = scmp.lt.u32.totalorder %s728_s26, %s981_s0 }
  0x29   :  { %p734_p4 = pnand %p732_p3, %p729_p2 }
  0x2b   :  { %737 = shalt.err (!%p734_p4)
}
  0x2c   :  { %s738_s7 = scalar_lea.vmem %s23_s14, 64  ;;  %p743_p6 = scmp.lt.s32.totalorder %s23_s14, %s23_s14 }
  0x2d   :  { %p739_p5 = scmp.ne.s32.totalorder %s23_s14, %s738_s7  ;;  %p744_p7 = scmp.lt.s32.totalorder %s738_s7, %s738_s7 }
  0x2f   :  { %p745_p8 = por %p744_p7, %p743_p6 }
  0x31   :  { %p746_p9 = pnand %p745_p8, %p739_p5 }
  0x33   :  { %749 = shalt.err (!%p746_p9)
}
  0x34   :  { %25 = dma.hbm_to_vmem [thread:$0]  %s981_s0, 64, %s23_s14, [#allocation4]  }
  0x35   :  { %s853_s9 = smov [#allocation8]   ;;  %s750_s13 = scalar_lea.hbm %s983_s2, 2048 }
  0x36   :  { %s43_s10 = sshll.u32 %s853_s9, 4  ;;  %p751_p10 = scmp.ne.s32.totalorder %s983_s2, %s750_s13  ;;  %s44_s10 = int_to_ptr.vmem [resolvable:$true] %s43_s10 }
  0x37   :  { %p754_p11 = scmp.lt.u32.totalorder %s750_s13, %s983_s2 }
  0x39   :  { %p756_p12 = pnand %p754_p11, %p751_p10 }
  0x3b   :  { %759 = shalt.err (!%p756_p12)
}
  0x3c   :  { %s760_s19 = scalar_lea.vmem %s44_s10, 2048  ;;  %p765_p0 = scmp.lt.s32.totalorder %s44_s10, %s44_s10 }
  0x3d   :  { %p761_p13 = scmp.ne.s32.totalorder %s44_s10, %s760_s19  ;;  %p766_p1 = scmp.lt.s32.totalorder %s760_s19, %s760_s19 }
  0x3f   :  { %p767_p2 = por %p766_p1, %p765_p0 }
  0x41   :  { %p768_p3 = pnand %p767_p2, %p761_p13 }
  0x43   :  { %771 = shalt.err (!%p768_p3)
}
  0x44   :  { %s854_s0 = smov 128   ;;  %s855_s14 = smov 8  }
  0x45   :  { %49 = dma.hbm_to_vmem [thread:$0]  %s983_s2, 2048, %s44_s10, [#allocation7], %s854_s0, %s854_s0, %s855_s14  }
  0x46   :  { %s856_s1 = smov [#allocation11]   ;;  %s857_s23 = smov [#allocation12]  }
  0x47   :  { %s65_s22 = sshll.u32 %s856_s1, 4  ;;  %s78_s24 = sshll.u32 %s857_s23, 4  ;;  %s66_s22 = int_to_ptr.vmem [resolvable:$true] %s65_s22  ;;  %s79_s24 = int_to_ptr.vmem [resolvable:$true] %s78_s24 }
  0x48   :  { %s772_s27 = scalar_lea.hbm %s985_s4, 4096 }
  0x49   :  { %p773_p4 = scmp.ne.s32.totalorder %s985_s4, %s772_s27  ;;  %p776_p5 = scmp.lt.u32.totalorder %s772_s27, %s985_s4 }
  0x4b   :  { %p778_p6 = pnand %p776_p5, %p773_p4 }
  0x4d   :  { %781 = shalt.err (!%p778_p6)
}
  0x4e   :  { %s782_s2 = scalar_lea.vmem %s66_s22, 4096  ;;  %p787_p8 = scmp.lt.s32.totalorder %s66_s22, %s66_s22 }
  0x4f   :  { %p783_p7 = scmp.ne.s32.totalorder %s66_s22, %s782_s2  ;;  %p788_p9 = scmp.lt.s32.totalorder %s782_s2, %s782_s2 }
  0x51   :  { %p789_p10 = por %p788_p9, %p787_p8 }
  0x53   :  { %p790_p11 = pnand %p789_p10, %p783_p7 }
  0x55   :  { %793 = shalt.err (!%p790_p11)
}
  0x56   :  { %71 = dma.hbm_to_vmem [thread:$0]  %s985_s4, 4096, %s66_s22, [#allocation10], %s854_s0, %s854_s0, %s855_s14  }
  0x57   :  { %s794_s11 = scalar_lea.hbm %s986_s5, 16 }
  0x58   :  { %p795_p12 = scmp.ne.s32.totalorder %s986_s5, %s794_s11  ;;  %p798_p13 = scmp.lt.u32.totalorder %s794_s11, %s986_s5 }
  0x5a   :  { %p800_p0 = pnand %p798_p13, %p795_p12 }
  0x5c   :  { %803 = shalt.err (!%p800_p0)
}
  0x5d   :  { %s804_s17 = scalar_lea.vmem %s79_s24, 16  ;;  %s808_s18 = scalar_lea.vmem %s79_s24, 32 }
  0x5e   :  { %p805_p1 = scmp.ne.s32.totalorder %s79_s24, %s804_s17  ;;  %p809_p2 = scmp.lt.s32.totalorder %s79_s24, %s79_s24 }
  0x5f   :  { %p810_p3 = scmp.lt.s32.totalorder %s808_s18, %s804_s17 }
  0x61   :  { %p811_p4 = por %p810_p3, %p809_p2 }
  0x63   :  { %p812_p5 = pnand %p811_p4, %p805_p1 }
  0x65   :  { %815 = shalt.err (!%p812_p5)
}
  0x66   :  { %81 = dma.hbm_to_vmem [thread:$0]  %s986_s5, 16, %s79_s24, [#allocation13]  }
  0x67   :  { %838 = dma.done.wait [#allocation4], 64  }
  0x68   :  { %839 = vsyncadd [#allocation4], 4294967232 }
  0x69   :  { %840 = dma.done.wait [#allocation7], 3072  }
  0x6a   :  { %841 = vsyncadd [#allocation7], 4294964224 }
  0x6b   :  { %842 = dma.done.wait [#allocation10], 4128  }
  0x6c   :  { %843 = vsyncadd [#allocation10], 4294963168 }
  0x6d   :  { %844 = dma.done.wait [#allocation13], 16  }
  0x6e   :  { %845 = vsyncadd [#allocation13], 4294967280  ;;  %v858_v0 = vmov 0.0   ;;  %vm859_vm0 = vmmov 0   ;;  %v648_v1 = vld [vmem:[#allocation6] sm:$0xff]   ;;  %v649_v2 = vld [vmem:[#allocation6 + $0x8] sm:$0xff]  }
  0x6f   :  { %582 = vmatprep.subr.bf16.mxu0 %v858_v0  ;;  %598 = vmatprep.mubr.msk.bf16.mxu0 %vm859_vm0, %v858_v0  ;;  %v650_v3 = vld [vmem:[#allocation6 + $0x10] sm:$0xff]   ;;  %v656_v4 = vld [vmem:[#allocation8 + $0x4] ss:$8 sps:$4 sm:$0xff]   ;;  %v658_v5 = vld [vmem:[#allocation8] ss:$8 sps:$4 sm:$0xff]   ;;  %v860_v26 = vmov 0  }
  0x70   :  { %583 = vmatpush3.bf16.msra.mxu0 %v648_v1  ;;  %v651_v6 = vld [vmem:[#allocation6 + $0x18] sm:$0xff]   ;;  %328 = vmatprep.subr.bf16.mxu1 %v656_v4  ;;  %v662_v9 = vld [vmem:[#allocation8 + $0x24] ss:$8 sps:$4 sm:$0xff]   ;;  %v664_v11 = vld [vmem:[#allocation8 + $0x20] ss:$8 sps:$4 sm:$0xff]   ;;  %s861_s5 = smov [#allocation14]  }
  0x71   :  { %584 = vmatprep.subr.bf16.mxu0 %v858_v0  ;;  %v659_v7 = vld [vmem:[#allocation8 + $0x14] ss:$8 sps:$4 sm:$0xff]   ;;  %329 = vmatpush1.bf16.msra.mxu1 %v658_v5  ;;  %v661_v8 = vld [vmem:[#allocation8 + $0x10] ss:$8 sps:$4 sm:$0xff]   ;;  %v652_v10 = vld [vmem:[#allocation6 + $0x20] sm:$0xff]   ;;  %s501_s0 = sshll.u32 %s861_s5, 4  ;;  %s502_s0 = int_to_ptr.vmem [resolvable:$true] %s501_s0 }
  0x72   :  { %330 = vmatprep.subr.bf16.mxu1 %v659_v7  ;;  %v665_v12 = vld [vmem:[#allocation8 + $0x34] ss:$8 sps:$4 sm:$0xff]   ;;  %v653_v13 = vld [vmem:[#allocation6 + $0x28] sm:$0xff]   ;;  %v667_v14 = vld [vmem:[#allocation8 + $0x30] ss:$8 sps:$4 sm:$0xff]   ;;  %360 = vmatprep.mubr.bf16.mxu1 %v860_v26  ;;  %s816_s14 = scalar_lea.vmem %s502_s0, 128  ;;  %p821_p7 = scmp.lt.s32.totalorder %s502_s0, %s502_s0 }
  0x73   :  { %v668_v15 = vld [vmem:[#allocation8 + $0x44] ss:$8 sps:$4 sm:$0xff]   ;;  %v654_v16 = vld [vmem:[#allocation6 + $0x30] sm:$0xff]   ;;  %v670_v17 = vld [vmem:[#allocation8 + $0x40] ss:$8 sps:$4 sm:$0xff]   ;;  %p817_p6 = scmp.ne.s32.totalorder %s502_s0, %s816_s14  ;;  %p822_p8 = scmp.lt.s32.totalorder %s816_s14, %s816_s14 }
  0x74   :  { %585 = vmatpush3.bf16.msra.mxu0 %v649_v2  ;;  %v671_v18 = vld [vmem:[#allocation8 + $0x54] ss:$8 sps:$4 sm:$0xff]   ;;  %v673_v20 = vld [vmem:[#allocation8 + $0x50] ss:$8 sps:$4 sm:$0xff]   ;;  %v674_v21 = vld [vmem:[#allocation8 + $0x64] ss:$8 sps:$4 sm:$0xff]  }
  0x75   :  { %586 = vmatprep.subr.bf16.mxu0 %v858_v0  ;;  %331 = vmatpush1.bf16.msra.mxu1 %v661_v8  ;;  %v655_v19 = vld [vmem:[#allocation6 + $0x38] sm:$0xff]   ;;  %v676_v23 = vld [vmem:[#allocation8 + $0x60] ss:$8 sps:$4 sm:$0xff]   ;;  %p823_p9 = por %p822_p8, %p821_p7 }
  0x76   :  { %332 = vmatprep.subr.bf16.mxu1 %v662_v9  ;;  %v107_v22 = vld [vmem:[#allocation3] sm:$0xf]  ;;  %v679_v25 = vld [vmem:[#allocation8 + $0x70] ss:$8 sps:$4 sm:$0xff]   ;;  %v387_v27 = vld [vmem:[#allocation11 + $0x80] sm:$0xff] }
  0x77   :  { %v677_v24 = vld [vmem:[#allocation8 + $0x74] ss:$8 sps:$4 sm:$0xff]   ;;  %v388_v28 = vld [vmem:[#allocation11 + $0x88] sm:$0xff]  ;;  %v371_v29 = vld [vmem:[#allocation11] sm:$0xff]  ;;  %p824_p10 = pnand %p823_p9, %p817_p6 }
  0x78   :  { %587 = vmatpush3.bf16.msra.mxu0 %v650_v3  ;;  %v602_v30 = vpack.c.bf16 %v388_v28, %v387_v27  ;;  %v372_v31 = vld [vmem:[#allocation11 + $0x8] sm:$0xff]  ;;  %v389_v32 = vld [vmem:[#allocation11 + $0x90] sm:$0xff]  ;;  %v390_v33 = vld [vmem:[#allocation11 + $0x98] sm:$0xff] }
  0x79   :  { %588 = vmatprep.subr.bf16.mxu0 %v858_v0  ;;  %333 = vmatpush1.bf16.msra.mxu1 %v664_v11  ;;  %v604_v34 = vpack.c.bf16 %v372_v31, %v371_v29  ;;  %v606_v35 = vpack.c.bf16 %v390_v33, %v389_v32  ;;  %v373_v36 = vld [vmem:[#allocation11 + $0x10] sm:$0xff]  ;;  %v374_v37 = vld [vmem:[#allocation11 + $0x18] sm:$0xff]  ;;  %v391_v38 = vld [vmem:[#allocation11 + $0xa0] sm:$0xff] }
  0x7a   :  { %334 = vmatprep.subr.bf16.mxu1 %v665_v12  ;;  %v392_v39 = vld [vmem:[#allocation11 + $0xa8] sm:$0xff]  ;;  %v608_v40 = vpack.c.bf16 %v374_v37, %v373_v36  ;;  %v375_v42 = vld [vmem:[#allocation11 + $0x20] sm:$0xff]  ;;  %v393_v44 = vld [vmem:[#allocation11 + $0xb0] sm:$0xff] }
  0x7b   :  { %v610_v41 = vpack.c.bf16 %v392_v39, %v391_v38  ;;  %v376_v43 = vld [vmem:[#allocation11 + $0x28] sm:$0xff]  ;;  %v394_v45 = vld [vmem:[#allocation11 + $0xb8] sm:$0xff]  ;;  %v377_v48 = vld [vmem:[#allocation11 + $0x30] sm:$0xff] }
  0x7c   :  { %589 = vmatpush3.bf16.msra.mxu0 %v651_v6  ;;  %v612_v46 = vpack.c.bf16 %v376_v43, %v375_v42  ;;  %v614_v47 = vpack.c.bf16 %v394_v45, %v393_v44  ;;  %v378_v49 = vld [vmem:[#allocation11 + $0x38] sm:$0xff]  ;;  %v395_v50 = vld [vmem:[#allocation11 + $0xc0] sm:$0xff]  ;;  %v396_v51 = vld [vmem:[#allocation11 + $0xc8] sm:$0xff] }
  0x7d   :  { %590 = vmatprep.subr.bf16.mxu0 %v858_v0  ;;  %335 = vmatpush1.bf16.msra.mxu1 %v667_v14  ;;  %v616_v52 = vpack.c.bf16 %v378_v49, %v377_v48  ;;  %v618_v53 = vpack.c.bf16 %v396_v51, %v395_v50  ;;  %v379_v54 = vld [vmem:[#allocation11 + $0x40] sm:$0xff]  ;;  %v380_v55 = vld [vmem:[#allocation11 + $0x48] sm:$0xff]  ;;  %v397_v56 = vld [vmem:[#allocation11 + $0xd0] sm:$0xff] }
  0x7e   :  { %336 = vmatprep.subr.bf16.mxu1 %v668_v15  ;;  %v398_v57 = vld [vmem:[#allocation11 + $0xd8] sm:$0xff]  ;;  %v620_v58 = vpack.c.bf16 %v380_v55, %v379_v54  ;;  %v381_v60 = vld [vmem:[#allocation11 + $0x50] sm:$0xff]  ;;  %v399_v62 = vld [vmem:[#allocation11 + $0xe0] sm:$0xff] }
  0x7f   :  { %v622_v59 = vpack.c.bf16 %v398_v57, %v397_v56  ;;  %v382_v61 = vld [vmem:[#allocation11 + $0x58] sm:$0xff]  ;;  %v400_v63 = vld [vmem:[#allocation11 + $0xe8] sm:$0xff]  ;;  %v383_v8 = vld [vmem:[#allocation11 + $0x60] sm:$0xff] }
  0x80   :  { %591 = vmatpush3.bf16.msra.mxu0 %v652_v10  ;;  %v626_v1 = vpack.c.bf16 %v400_v63, %v399_v62  ;;  %v384_v9 = vld [vmem:[#allocation11 + $0x68] sm:$0xff]  ;;  %v401_v11 = vld [vmem:[#allocation11 + $0xf0] sm:$0xff]  ;;  %v402_v12 = vld [vmem:[#allocation11 + $0xf8] sm:$0xff] }
  0x81   :  { %592 = vmatprep.subr.bf16.mxu0 %v858_v0  ;;  %337 = vmatpush1.bf16.msra.mxu1 %v670_v17  ;;  %v628_v10 = vpack.c.bf16 %v384_v9, %v383_v8  ;;  %v385_v14 = vld [vmem:[#allocation11 + $0x70] sm:$0xff]  ;;  %v386_v15 = vld [vmem:[#allocation11 + $0x78] sm:$0xff]  ;;  %v238_v17 = vlaneseq }
  0x82   :  { %338 = vmatprep.subr.bf16.mxu1 %v671_v18 }
  0x83   :  { %v239_v18 = vshrl.u32 %v238_v17, 7  ;;  %v481_v32 = vand.u32 127, %v238_v17 }
  0x84   :  { %593 = vmatpush3.bf16.msra.mxu0 %v653_v13  ;;  %v630_v13 = vpack.c.bf16 %v402_v12, %v401_v11 }
  0x85   :  { %594 = vmatprep.subr.bf16.mxu0 %v858_v0  ;;  %339 = vmatpush1.bf16.msra.mxu1 %v673_v20  ;;  %v236_v20 = vld [vmem:[#allocation9] sm:$0x3]  ;;  %vm482_vm1 = vcmp.lt.s32.totalorder %v481_v32, 2 }
  0x86   :  { %340 = vmatprep.subr.bf16.mxu1 %v674_v21  ;;  %v244_v21 = vsub.s32 1, %v239_v18 }
  0x88   :  { %595 = vmatpush3.bf16.msra.mxu0 %v654_v16  ;;  %v632_v16 = vpack.c.bf16 %v386_v15, %v385_v14 }
  0x89   :  { %596 = vmatprep.subr.bf16.mxu0 %v858_v0  ;;  %341 = vmatpush1.bf16.msra.mxu1 %v676_v23  ;;  %v624_v0 = vpack.c.bf16 %v382_v61, %v381_v60  ;;  %v245_v23 = vrot.slane %v236_v20, %v244_v21 }
  0x8a   :  { %342 = vmatprep.subr.bf16.mxu1 %v677_v24 }
  0x8c   :  { %597 = vmatpush3.bf16.msra.mxu0 %v655_v19  ;;  %v240_v19 = vsub.s32 0, %v239_v18 }
  0x8d   :  { %343 = vmatpush1.bf16.msra.mxu1 %v679_v25  ;;  %603 = vmatprep.subr.bf16.mxu0 %v602_v30 }
  0x8f   :  { %599 = vmatmul.mubr.bf16.vlgmr.msra.gmra.mrb[0].mxu0 %v107_v22  ;;  %v241_v22 = vrot.slane %v236_v20, %v240_v19 }
  0x90   :  { %605 = vmatpush3.bf16.msra.mxu0 %v604_v34 }
  0x91   :  { %607 = vmatprep.subr.bf16.mxu0 %v606_v35  ;;  %v537_v35 = vld [vmem:[#allocation12] ss:$0 sm:$0xff] }
  0x94   :  { %609 = vmatpush3.bf16.msra.mxu0 %v608_v40 }
  0x95   :  { %611 = vmatprep.subr.bf16.mxu0 %v610_v41 }
  0x98   :  { %613 = vmatpush3.bf16.msra.mxu0 %v612_v46 }
  0x99   :  { %615 = vmatprep.subr.bf16.mxu0 %v614_v47 }
  0x9c   :  { %617 = vmatpush3.bf16.msra.mxu0 %v616_v52 }
  0x9d   :  { %619 = vmatprep.subr.bf16.mxu0 %v618_v53 }
  0xa0   :  { %621 = vmatpush3.bf16.msra.mxu0 %v620_v58 }
  0xa1   :  { %623 = vmatprep.subr.bf16.mxu0 %v622_v59 }
  0xa4   :  { %625 = vmatpush3.bf16.msra.mxu0 %v624_v0 }
  0xa5   :  { %627 = vmatprep.subr.bf16.mxu0 %v626_v1 }
  0xa8   :  { %629 = vmatpush3.bf16.msra.mxu0 %v628_v10 }
  0xa9   :  { %631 = vmatprep.subr.bf16.mxu0 %v630_v13 }
  0xac   :  { %633 = vmatpush3.bf16.msra.mxu0 %v632_v16 }
 0x162   :  { %v206_v2 = vpop.f32.mrb[0].mxu0 }
 0x163   :  { %v218_v3 = vmul.f32 0.125, %v206_v2  ;;  %v600_v4 = vpop.f32.mrb[1].mxu0 }
 0x164   :  { %v209_v5 = vpop.f32.mrb[2].mxu0 }
 0x165   :  { %v219_v6 = vpack.c.bf16 %v218_v3, %v218_v3  ;;  %v601_v7 = vpop.f32.mrb[3].mxu0 }
 0x167   :  { %361 = vmatmul.mubr.bf16.vlgmr.msra.gmra.mrb[0].mxu1 %v219_v6 }
 0x23a   :  { %v362_v24 = vpop.f32.mrb[0].mxu1 }
 0x23b   :  { %v363_v25 = vadd.f32 %v362_v24, %v241_v22  ;;  %v364_v26 = vpop.f32.mrb[1].mxu1 }
 0x23c   :  { %v365_v27 = vadd.f32 %v364_v26, %v245_v23  ;;  %v366_v28 = vpop.f32.mrb[2].mxu1 }
 0x23d   :  { %v367_v29 = vpop.f32.mrb[3].mxu1  ;;  %v369_v31 = vmax.f32 %v363_v25, 0.0 }
 0x23e   :  { %v370_v30 = vmax.f32 %v365_v27, 0.0 }
 0x240   :  { %474 = vmatprep.mubr.f32.mxu0 %v370_v30 }
 0x241   :  { %475 = vmatmul.mubr.f32.vlgmr.msra.gmra.mrb[4].mxu0 %v369_v31 }
 0x314   :  { %v579_v33 = vpop.f32.mrb[4].mxu0 }
 0x315   :  { %v580_v34 = vpop.f32.mrb[5].mxu0 }
 0x316   :  { %v581_v36 = vadd.f32 %v580_v34, %v579_v33 }
 0x318   :  { %v477_v37 = vadd.f32 %v581_v36, %v537_v35 }
 0x31a   :  { %v483_v38 = vsel %vm482_vm1, %v477_v37, -1e+30 }
 0x31b   :  { %484 = vmax.xlane.f32.xlu0 %v483_v38 }
 0x3a8   :  { %v485_v39 = vpop.xlane.xlu0 %484 }
 0x3a9   :  { %v486_v40 = vsub.f32 %v483_v38, %v485_v39 }
 0x3ab   :  { %v487_v41 = vmul.f32 1.442695, %v486_v40 }
 0x3ad   :  { %680 = vpow2.f32 %v487_v41 }
 0x3b7   :  { %v681_v42 = vpop.eup %680 }
 0x3b8   :  { %489 = vadd.xlane.f32.xlu0 %v681_v42 }
 0x445   :  { %v490_v43 = vpop.xlane.xlu0 %489 }
 0x446   :  { %682 = vlog2.f32 %v490_v43 }
 0x450   :  { %v683_v44 = vpop.eup %682 }
 0x451   :  { %v492_v45 = vmul.f32 0.6931472, %v683_v44 }
 0x453   :  { %v493_v46 = vsub.f32 %v486_v40, %v492_v45 }
 0x455   :  { %494 = vst [vmem:[#allocation14] sm:$0xff] %v493_v46 }
 0x456   :  { %827 = shalt.err (!%p824_p10)
}
 0x457   :  { %s828_s1 = scalar_lea.hbm %s987_s6, 128 }
 0x458   :  { %p829_p11 = scmp.ne.s32.totalorder %s987_s6, %s828_s1  ;;  %p832_p12 = scmp.lt.u32.totalorder %s828_s1, %s987_s6 }
 0x45a   :  { %p834_p13 = pnand %p832_p12, %p829_p11 }
 0x45c   :  { %837 = shalt.err (!%p834_p13)
}
 0x45d   :  { %504 = dma.vmem_to_hbm [thread:$0]  %s502_s0, 128, %s987_s6, [#allocation5]  }
 0x45e   :  { %846 = dma.done.wait [#allocation5], 128  }
 0x45f   :  { %847 = vsyncadd [#allocation5], 4294967168 }
 0x460   :  { %508 = vsyncpa [#allocation4], 1 }
 0x461   :  { %509 = vsyncpa [#allocation7], 1 }
 0x462   :  { %510 = vsyncpa [#allocation10], 1 }
 0x463   :  { %511 = vsyncpa [#allocation13], 1 }
 0x464   :  { %512 = vsyncpa [#allocation5], 1 }

</bundles_post_ra>
